<compile_context>
chip_gen: v7x
topology: tpu7x:2x2x1
jax: 0.10.0
libtpu: 0.0.40
codegen_flags: <defaults>
</compile_context>

<pallas_src>
import functools

import jax
import jax.numpy as jnp
from jax import lax
from jax.experimental import pallas as pl
from jax.experimental.pallas import tpu as pltpu


# ----------------------------------------------------------------------------
# Per-generation configuration (VMEM limit, matmul tiles).
# ----------------------------------------------------------------------------
def _tpu_config():
    kind = ""
    try:
        kind = jax.devices()[0].device_kind.lower()
    except Exception:
        pass
    vmem_phys = None
    try:
        info = pltpu.get_tpu_info()
        for attr in ("vmem_capacity_bytes", "vmem_bytes"):
            if hasattr(info, attr):
                vmem_phys = int(getattr(info, attr))
                break
    except Exception:
        pass
    if vmem_phys is None:
        vmem_phys = (64 if ("v7" in kind or "7x" in kind) else 128) * 1024 * 1024
    # ~80% of physical VMEM, capped: ~102 MiB on v5e/v6e, ~51 MiB on v7x.
    vmem_limit = min(vmem_phys * 4 // 5, 110 * 1024 * 1024)
    # v6e/v7x MXUs are 256x256 -> 256-wide matmul tiles; v5e's is 128x128.
    wide_mxu = ("v6" in kind) or ("v7" in kind) or ("7x" in kind)
    mm_tiles = (256, 256, 512) if wide_mxu else (128, 128, 256)
    return vmem_limit, mm_tiles


def _seq_tile(n, pref=256):
    """Query tile: full length if small, otherwise a large aligned divisor."""
    if n <= pref:
        return n
    for t in (pref, 128, 64, 32):
        if n % t == 0:
            return t
    return n  # TODO(synk): pad + mask ragged lq instead of a full-length tile.


def _tile_and_pad(dim, pref):
    """(tile, padded_dim): full dim if it fits in one tile, else the preferred
    tile with the dim padded up to a multiple of it (no full-dim fallback)."""
    if dim <= pref:
        return dim, dim
    if dim % pref == 0:
        return pref, dim
    return pref, pl.cdiv(dim, pref) * pref


# ----------------------------------------------------------------------------
# Tiled bias-free linear kernel: out = x @ w_t.  bf16 MXU operands (the x
# block is cast in-kernel, so f32 activations are streamed straight in),
# f32 accumulation in VMEM scratch.
# ----------------------------------------------------------------------------
def _matmul_kernel(x_ref, w_ref, o_ref, acc_ref):
    @pl.when(pl.program_id(2) == 0)
    def _():
        acc_ref[...] = jnp.zeros_like(acc_ref)

    acc_ref[...] += jnp.dot(
        x_ref[...].astype(jnp.bfloat16), w_ref[...],
        preferred_element_type=jnp.float32,
    )

    @pl.when(pl.program_id(2) == pl.num_programs(2) - 1)
    def _():
        o_ref[...] = acc_ref[...].astype(o_ref.dtype)


def linear(x, w_t, out_dtype, tiles, vmem_limit):
    """x: (M, K) f32/bf16 (cast to bf16 in-kernel).  w_t: (K, N) bf16."""
    m, k = x.shape
    k2, n = w_t.shape
    assert k == k2
    tm, mp = _tile_and_pad(m, tiles[0])
    tn, np_ = _tile_and_pad(n, tiles[1])
    tk, kp = _tile_and_pad(k, tiles[2])
    if (mp, kp) != (m, k):
        x = jnp.pad(x, ((0, mp - m), (0, kp - k)))
    if (kp, np_) != (k, n):
        w_t = jnp.pad(w_t, ((0, kp - k), (0, np_ - n)))
    out = pl.pallas_call(
        _matmul_kernel,
        out_shape=jax.ShapeDtypeStruct((mp, np_), out_dtype),
        grid=(mp // tm, np_ // tn, kp // tk),
        in_specs=[
            pl.BlockSpec((tm, tk), lambda i, j, kk: (i, kk)),
            pl.BlockSpec((tk, tn), lambda i, j, kk: (kk, j)),
        ],
        out_specs=pl.BlockSpec((tm, tn), lambda i, j, kk: (i, j)),
        scratch_shapes=[pltpu.VMEM((tm, tn), jnp.float32)],
        compiler_params=pltpu.CompilerParams(
            dimension_semantics=("parallel", "parallel", "arbitrary"),
            vmem_limit_bytes=vmem_limit,
        ),
    )(x, w_t)
    if (mp, np_) != (m, n):
        out = out[:m, :n]
    return out


# ----------------------------------------------------------------------------
# Attention core kernel: one (batch, lq-tile) per grid cell, heads looped
# inside.  The -1e30 additive bias is built in-kernel from the int8 mask.
# Per head:  s = q_h @ k_h^T (contract dh, no K transpose) + bias
#            p = softmax(s)  (f32, EUP approx reciprocal)
#            o_h = p @ v_h
# coverage = mean over heads of p, accumulated in registers and written once.
# Output is a single lane-dense (tq, d_model) store (heads concatenated).
# The 1/sqrt(d_head) scale is already folded into wq.
# ----------------------------------------------------------------------------
def attn_kernel(mask_ref, q_ref, k_ref, v_ref, out_ref, cov_ref, *, nheads, d_head):
    bias = mask_ref[...].astype(jnp.float32) * jnp.float32(-1e30)   # (tq, lk), VPU
    cov = jnp.zeros(bias.shape, jnp.float32)
    outs = []
    for hd in range(nheads):                          # static unroll over heads
        sl = slice(hd * d_head, (hd + 1) * d_head)
        q_h = q_ref[:, sl]                            # (tq, dh) bf16 (pre-scaled)
        k_h = k_ref[:, sl]                            # (lk, dh) bf16
        v_h = v_ref[:, sl]                            # (lk, dh) bf16
        s = lax.dot_general(                          # (tq, lk) f32, no K transpose
            q_h, k_h, (((1,), (1,)), ((), ())),
            preferred_element_type=jnp.float32,
        )
        s = s + bias
        m = jnp.max(s, axis=-1, keepdims=True)
        e = jnp.exp(s - m)
        l = jnp.sum(e, axis=-1, keepdims=True)
        p = e * pl.reciprocal(l, approx=True)         # EUP reciprocal, f32
        cov = cov + p
        o_h = jnp.dot(p.astype(v_h.dtype), v_h, preferred_element_type=jnp.float32)
        outs.append(o_h.astype(out_ref.dtype))
    out_ref[...] = jnp.concatenate(outs, axis=-1)     # single lane-dense store
    cov_ref[...] = (cov * (1.0 / nheads)).astype(cov_ref.dtype)


def attention_core(q, k, v, mask_i8, *, h, d_head, tq, vmem_limit,
                   cov_dtype=jnp.float32, banded=True):
    """banded=True:  q (lq, b*d_model), k/v (lk, b*d_model)   [no transposes]
       banded=False: q (b, lq, d_model), k/v (b, lk, d_model)  [fallback]"""
    d_model = h * d_head
    if banded:
        lq = q.shape[0]
        lk = k.shape[0]
        b = q.shape[1] // d_model
        q_spec = pl.BlockSpec((tq, d_model), lambda bi, qi: (qi, bi))
        kv_spec = pl.BlockSpec((lk, d_model), lambda bi, qi: (0, bi))
        o_spec = pl.BlockSpec((tq, d_model), lambda bi, qi: (qi, bi))
        o_shape = jax.ShapeDtypeStruct((lq, b * d_model), jnp.bfloat16)
    else:
        b, lq, _ = q.shape
        lk = k.shape[1]
        q_spec = pl.BlockSpec((None, tq, d_model), lambda bi, qi: (bi, qi, 0))
        kv_spec = pl.BlockSpec((None, lk, d_model), lambda bi, qi: (bi, 0, 0))
        o_spec = pl.BlockSpec((None, tq, d_model), lambda bi, qi: (bi, qi, 0))
        o_shape = jax.ShapeDtypeStruct((b, lq, d_model), jnp.bfloat16)
    mask_spec = pl.BlockSpec((None, tq, lk), lambda bi, qi: (bi, qi, 0))
    cov_spec = pl.BlockSpec((None, tq, lk), lambda bi, qi: (bi, qi, 0))

    kernel = functools.partial(attn_kernel, nheads=h, d_head=d_head)
    return pl.pallas_call(
        kernel,
        out_shape=(o_shape, jax.ShapeDtypeStruct((b, lq, lk), cov_dtype)),
        grid=(b, lq // tq),
        in_specs=[mask_spec, q_spec, kv_spec, kv_spec],
        out_specs=(o_spec, cov_spec),
        compiler_params=pltpu.CompilerParams(
            dimension_semantics=("parallel", "parallel"),
            vmem_limit_bytes=vmem_limit,
        ),
    )(mask_i8, q, k, v)


# ----------------------------------------------------------------------------
# Full module forward
# ----------------------------------------------------------------------------
def multi_head_attention(query, key, value, mask, params, h,
                         coverage_dtype=jnp.float32):
    """query: (lq, b, d_model), key/value: (lk, b, d_model), mask: (b, lq, lk) bool.

    Returns (out, coverage) = ((lq, b, d_model) f32, (b, lq, lk) coverage_dtype)."""
    lq, b, d_model = query.shape
    lk = key.shape[0]
    assert d_model % h == 0
    dh = d_model // h
    scale = float(dh) ** (-0.5)
    vmem_limit, mm_tiles = _tpu_config()

    # Parameter prep (one-time): transpose to (d_in, d_out), fold the query
    # scale into wq, cast to bf16 (MXU-native operands).
    wq_t = (params["wq"].T * scale).astype(jnp.bfloat16)
    wk_t = params["wk"].T.astype(jnp.bfloat16)
    wv_t = params["wv"].T.astype(jnp.bfloat16)
    wc_t = params["wc"].T.astype(jnp.bfloat16)

    # QKV projections on the raw f32 activations (bf16 cast fused in-kernel);
    # the row order stays time-major (lq, b), so no activation transposes.
    proj_q = linear(query.reshape(lq * b, d_model), wq_t, jnp.bfloat16, mm_tiles, vmem_limit)
    proj_k = linear(key.reshape(lk * b, d_model), wk_t, jnp.bfloat16, mm_tiles, vmem_limit)
    proj_v = linear(value.reshape(lk * b, d_model), wv_t, jnp.bfloat16, mm_tiles, vmem_limit)

    mask_i8 = mask.astype(jnp.int8)          # 1 B/elem stream; bias built in-kernel
    tq = _seq_tile(lq, 256)
    banded = (d_model % 128 == 0)            # lane-aligned per-batch column bands

    if banded:
        # Free reshapes (contiguous merges): (len*b, d) -> (len, b*d).  The
        # attention BlockSpecs pick batch bi's d_model-wide column band directly.
        q_a = proj_q.reshape(lq, b * d_model)
        k_a = proj_k.reshape(lk, b * d_model)
        v_a = proj_v.reshape(lk, b * d_model)
    else:
        # TODO(synk): layout fallback costs 3 XLA transposes (one HBM pass each).
        q_a = jnp.transpose(proj_q.reshape(lq, b, d_model), (1, 0, 2))
        k_a = jnp.transpose(proj_k.reshape(lk, b, d_model), (1, 0, 2))
        v_a = jnp.transpose(proj_v.reshape(lk, b, d_model), (1, 0, 2))

    attn_out, coverage = attention_core(
        q_a, k_a, v_a, mask_i8, h=h, d_head=dh, tq=tq,
        vmem_limit=vmem_limit, cov_dtype=coverage_dtype, banded=banded)

    # attn_dropout: identity in eval mode (see TODO at top).

    # Output projection.  In the banded path the rows are already in the final
    # (lq, b, d_model) order, so no output transpose is needed.
    if banded:
        out = linear(attn_out.reshape(lq * b, d_model), wc_t, jnp.float32,
                     mm_tiles, vmem_limit)
        out = out.reshape(lq, b, d_model)
    else:
        out = linear(attn_out.reshape(b * lq, d_model), wc_t, jnp.float32,
                     mm_tiles, vmem_limit)
        out = jnp.transpose(out.reshape(b, lq, d_model), (1, 0, 2))
    return out, coverage


# ----------------------------------------------------------------------------
# Pure-JAX f32 reference (sanity check)
# ----------------------------------------------------------------------------
def reference(query, key, value, mask, params, h):
    lq, b, d_model = query.shape
    lk = key.shape[0]
    dh = d_model // h
    pq = (query.reshape(lq * b, d_model) @ params["wq"].T).reshape(lq, b, h, dh)
    pk = (key.reshape(lk * b, d_model) @ params["wk"].T).reshape(lk, b, h, dh)
    pv = (value.reshape(lk * b, d_model) @ params["wv"].T).reshape(lk, b, h, dh)
    q = jnp.transpose(pq, (1, 2, 0, 3)) * (dh ** -0.5)
    k = jnp.transpose(pk, (1, 2, 0, 3))
    v = jnp.transpose(pv, (1, 2, 0, 3))
    s = jnp.einsum("bhqd,bhkd->bhqk", q, k)
    s = jnp.where(mask[:, None, :, :], -jnp.inf, s)
    p = jax.nn.softmax(s, axis=-1)
    cov = jnp.mean(p, axis=1)
    o = jnp.einsum("bhqk,bhkd->bhqd", p, v)
    o = jnp.transpose(o, (2, 0, 1, 3)).reshape(lq, b, d_model)
    o = (o.reshape(lq * b, d_model) @ params["wc"].T).reshape(lq, b, d_model)
    return o, cov


if __name__ == "__main__":
    # Small deterministic config.  d_model is a multiple of 128 so the
    # lane-aligned (transpose-free) batch-banded path is exercised.
    h = 4
    d_model = 128
    d_head = d_model // h
    b = 2
    len_q = 16
    len_k = 16

    key0 = jax.random.PRNGKey(0)
    k1, k2, k3, k4, k5, k6, k7 = jax.random.split(key0, 7)

    # Parameters (Linear, bias=False): weight shape (out_features, in_features).
    params = {
        "wq": 0.08 * jax.random.normal(k1, (h * d_head, d_model), jnp.float32),
        "wk": 0.08 * jax.random.normal(k2, (h * d_head, d_model), jnp.float32),
        "wv": 0.08 * jax.random.normal(k3, (h * d_head, d_model), jnp.float32),
        "wc": 0.08 * jax.random.normal(k4, (d_model, h * d_head), jnp.float32),
    }

    query = jax.random.normal(k5, (len_q, b, d_model), jnp.float32)
    key_in = jax.random.normal(k6, (len_k, b, d_model), jnp.float32)
    value = jax.random.normal(k7, (len_k, b, d_model), jnp.float32)

    # Padding-style mask: batch 1 has its last 4 key positions masked out.
    mask = jnp.zeros((b, len_q, len_k), dtype=bool)
    mask = mask.at[1, :, len_k - 4:].set(True)

    out, coverage = multi_head_attention(query, key_in, value, mask, params, h)
    out = jax.block_until_ready(out)
    coverage = jax.block_until_ready(coverage)

    # Sanity check against a pure-JAX f32 reference (kernel runs bf16 on the
    # MXU, so use bf16-appropriate tolerances).
    ref_out, ref_cov = reference(query, key_in, value, mask, params, h)
    assert out.shape == (len_q, b, d_model)
    assert coverage.shape == (b, len_q, len_k)
    assert jnp.allclose(out, ref_out, atol=4e-2, rtol=4e-2), \
        float(jnp.max(jnp.abs(out - ref_out)))
    assert jnp.allclose(coverage, ref_cov, atol=2e-2, rtol=2e-2), \
        float(jnp.max(jnp.abs(coverage - ref_cov)))

    print("KERNEL_OK")
</pallas_src>

<mosaic_0001>
module attributes {stable_mosaic.version = 11 : i64} {
  func.func @_matmul_kernel(%arg0: i32, %arg1: i32, %arg2: i32, %arg3: memref<32x128xf32, #tpu.memory_space<vmem>>, %arg4: memref<128x128xbf16, #tpu.memory_space<vmem>>, %arg5: memref<32x128xbf16, #tpu.memory_space<vmem>>, %arg6: memref<32x128xf32, #tpu.memory_space<vmem>>) attributes {dimension_semantics = [#tpu.dimension_semantics<parallel>, #tpu.dimension_semantics<parallel>, #tpu.dimension_semantics<arbitrary>], iteration_bounds = array<i64: 1, 1, 1>, scalar_prefetch = 0 : i64, scratch_operands = 1 : i64, tpu.core_type = #tpu.core_type<tc>, window_params = [{transform_indices = @transform_0, window_bounds = array<i64: 32, 128>}, {transform_indices = @transform_1, window_bounds = array<i64: 128, 128>}, {transform_indices = @transform_2, window_bounds = array<i64: 32, 128>}]} {
    %c0_i32 = arith.constant 0 : i32
    %0 = arith.cmpi eq, %arg2, %c0_i32 : i32
    %1 = arith.extui %0 : i1 to i32
    %c0_i32_0 = arith.constant 0 : i32
    %2 = arith.cmpi ne, %1, %c0_i32_0 : i32
    scf.if %2 {
      %cst_10 = arith.constant 0.000000e+00 : f32
      %13 = vector.broadcast %cst_10 : f32 to vector<32x128xf32>
      %c0_11 = arith.constant 0 : index
      %c0_12 = arith.constant 0 : index
      %14 = vector.load %arg6[%c0_11, %c0_12] : memref<32x128xf32, #tpu.memory_space<vmem>>, vector<32x128xf32>
      tpu.vector_store %arg6[%c0_11, %c0_12], %13 {strides = array<i32>} : memref<32x128xf32, #tpu.memory_space<vmem>>, vector<32x128xf32>,
    } else {
    }
    %c0 = arith.constant 0 : index
    %c0_1 = arith.constant 0 : index
    %3 = vector.load %arg6[%c0, %c0_1] : memref<32x128xf32, #tpu.memory_space<vmem>>, vector<32x128xf32>
    %c0_2 = arith.constant 0 : index
    %c0_3 = arith.constant 0 : index
    %4 = vector.load %arg3[%c0_2, %c0_3] : memref<32x128xf32, #tpu.memory_space<vmem>>, vector<32x128xf32>
    %5 = arith.truncf %4 : vector<32x128xf32> to vector<32x128xbf16>
    %c0_4 = arith.constant 0 : index
    %c0_5 = arith.constant 0 : index
    %6 = vector.load %arg4[%c0_4, %c0_5] : memref<128x128xbf16, #tpu.memory_space<vmem>>, vector<128x128xbf16>
    %cst = arith.constant dense<0.000000e+00> : vector<32x128xf32>
    %7 = tpu.matmul %5, %6, %cst {dimension_numbers = #tpu.dot_dimension_numbers<[1], [0], [0], [1], [0, 0, 1, 1], [], []>} : vector<32x128xbf16>, vector<128x128xbf16>, vector<32x128xf32> -> vector<32x128xf32>
    %8 = arith.addf %3, %7 : vector<32x128xf32>
    %c0_6 = arith.constant 0 : index
    %c0_7 = arith.constant 0 : index
    %9 = vector.load %arg6[%c0_6, %c0_7] : memref<32x128xf32, #tpu.memory_space<vmem>>, vector<32x128xf32>
    tpu.vector_store %arg6[%c0_6, %c0_7], %8 {strides = array<i32>} : memref<32x128xf32, #tpu.memory_space<vmem>>, vector<32x128xf32>,
    %c0_i32_8 = arith.constant 0 : i32
    %10 = arith.cmpi eq, %arg2, %c0_i32_8 : i32
    %11 = arith.extui %10 : i1 to i32
    %c0_i32_9 = arith.constant 0 : i32
    %12 = arith.cmpi ne, %11, %c0_i32_9 : i32
    scf.if %12 {
      %c0_10 = arith.constant 0 : index
      %c0_11 = arith.constant 0 : index
      %13 = vector.load %arg6[%c0_10, %c0_11] : memref<32x128xf32, #tpu.memory_space<vmem>>, vector<32x128xf32>
      %14 = arith.truncf %13 : vector<32x128xf32> to vector<32x128xbf16>
      %c0_12 = arith.constant 0 : index
      %c0_13 = arith.constant 0 : index
      %15 = vector.load %arg5[%c0_12, %c0_13] : memref<32x128xbf16, #tpu.memory_space<vmem>>, vector<32x128xbf16>
      tpu.vector_store %arg5[%c0_12, %c0_13], %14 {strides = array<i32>} : memref<32x128xbf16, #tpu.memory_space<vmem>>, vector<32x128xbf16>,
    } else {
    }
    return
  }
  func.func @transform_0(%arg0: i32, %arg1: i32, %arg2: i32) -> (i32, i32) {
    %c0_i32 = arith.constant 0 : i32
    return %arg0, %arg2 : i32, i32
  }
  func.func @transform_1(%arg0: i32, %arg1: i32, %arg2: i32) -> (i32, i32) {
    %c0_i32 = arith.constant 0 : i32
    return %arg2, %arg1 : i32, i32
  }
  func.func @transform_2(%arg0: i32, %arg1: i32, %arg2: i32) -> (i32, i32) {
    %c0_i32 = arith.constant 0 : i32
    return %arg0, %arg1 : i32, i32
  }
}

</mosaic_0001>

<bundles_post_ra>
// kernel: tpu_custom_call.1
= control target key start
LH: loop header
LB: loop body
LE: loop exit
PB: predicated region body
PF: predicated region fallthrough
CT: control target
= control target key end

     0   :  { %7 = vsyncpa [#allocation4], 0  ;;  %s433_s0 = inlined_call_operand.hbm [shape: f32[32,128], index: 0, kind: input, shape index: {}]   ;;  %s434_s1 = inlined_call_operand.hbm [shape: bf16[128,128], index: 1, kind: input, shape index: {}]   ;;  %s435_s2 = inlined_call_operand.hbm [shape: bf16[32,128], index: 2, kind: output, shape index: {}]  }
   0x1   :  { %8 = vsyncpa [#allocation7], 0 }
   0x2   :  { %9 = vsyncpa [#allocation5], 0  ;;  %s369_s9 = smov [#allocation3]   ;;  %s297_s13 = scalar_lea.hbm %s433_s0, 512 }
   0x3   :  { %s15_s10 = sshll.u32 %s369_s9, 4  ;;  %p298_p0 = scmp.ne.s32.totalorder %s433_s0, %s297_s13  ;;  %s16_s10 = int_to_ptr.vmem [resolvable:$true] %s15_s10 }
   0x4   :  { %p301_p1 = scmp.lt.u32.totalorder %s297_s13, %s433_s0 }
   0x6   :  { %p303_p2 = pnand %p301_p1, %p298_p0 }
   0x8   :  { %306 = shalt.err (!%p303_p2)
}
   0x9   :  { %s307_s18 = scalar_lea.vmem %s16_s10, 512  ;;  %p312_p4 = scmp.lt.s32.totalorder %s16_s10, %s16_s10 }
   0xa   :  { %p308_p3 = scmp.ne.s32.totalorder %s16_s10, %s307_s18  ;;  %p313_p5 = scmp.lt.s32.totalorder %s307_s18, %s307_s18 }
   0xc   :  { %p314_p6 = por %p313_p5, %p312_p4 }
   0xe   :  { %p315_p7 = pnand %p314_p6, %p308_p3 }
  0x10   :  { %318 = shalt.err (!%p315_p7)
}
  0x11   :  { %s370_s19 = smov 128   ;;  %s371_s20 = smov 8  }
  0x12   :  { %21 = dma.hbm_to_vmem [thread:$0]  %s433_s0, 512, %s16_s10, [#allocation4], %s370_s19, %s370_s19, %s371_s20  }
  0x13   :  { %s372_s23 = smov [#allocation6]   ;;  %s319_s27 = scalar_lea.hbm %s434_s1, 1024 }
  0x14   :  { %s27_s24 = sshll.u32 %s372_s23, 4  ;;  %p320_p8 = scmp.ne.s32.totalorder %s434_s1, %s319_s27  ;;  %s28_s24 = int_to_ptr.vmem [resolvable:$true] %s27_s24 }
  0x15   :  { %p323_p9 = scmp.lt.u32.totalorder %s319_s27, %s434_s1 }
  0x17   :  { %p325_p10 = pnand %p323_p9, %p320_p8 }
  0x19   :  { %328 = shalt.err (!%p325_p10)
}
  0x1a   :  { %s329_s4 = scalar_lea.vmem %s28_s24, 1024  ;;  %p334_p12 = scmp.lt.s32.totalorder %s28_s24, %s28_s24 }
  0x1b   :  { %p330_p11 = scmp.ne.s32.totalorder %s28_s24, %s329_s4  ;;  %p335_p13 = scmp.lt.s32.totalorder %s329_s4, %s329_s4 }
  0x1d   :  { %p336_p0 = por %p335_p13, %p334_p12 }
  0x1f   :  { %p337_p1 = pnand %p336_p0, %p330_p11 }
  0x21   :  { %340 = shalt.err (!%p337_p1)
}
  0x22   :  { %s373_s0 = smov 64   ;;  %s374_s5 = smov 4  }
  0x23   :  { %33 = dma.hbm_to_vmem [thread:$0]  %s434_s1, 1024, %s28_s24, [#allocation7], %s373_s0, %s373_s0, %s374_s5  }
  0x24   :  { %363 = dma.done.wait [#allocation4], 512  }
  0x25   :  { %364 = vsyncadd [#allocation4], 4294966784 }
  0x26   :  { %365 = dma.done.wait [#allocation7], 1024  }
  0x27   :  { %366 = vsyncadd [#allocation7], 4294966272  ;;  %v289_v0 = vld [vmem:[#allocation6] sm:$0xff]   ;;  %v290_v1 = vld [vmem:[#allocation6 + $0x8] sm:$0xff]   ;;  %s375_s1 = smov [#allocation8]  }
  0x28   :  { %262 = vmatprep.subr.bf16.mxu0 %v289_v0  ;;  %v291_v2 = vld [vmem:[#allocation6 + $0x10] sm:$0xff]   ;;  %v292_v3 = vld [vmem:[#allocation6 + $0x18] sm:$0xff]   ;;  %v53_v4 = vld [vmem:[#allocation3] sm:$0xff]  ;;  %s212_s8 = sshll.u32 %s375_s1, 4  ;;  %s213_s8 = int_to_ptr.vmem [resolvable:$true] %s212_s8 }
  0x29   :  { %263 = vmatpush3.bf16.msra.mxu0 %v289_v0  ;;  %v54_v5 = vld [vmem:[#allocation3 + $0x8] sm:$0xff]  ;;  %v293_v7 = vld [vmem:[#allocation6 + $0x20] sm:$0xff]   ;;  %v295_v9 = vld [vmem:[#allocation6 + $0x30] sm:$0xff]   ;;  %s341_s9 = scalar_lea.vmem %s213_s8, 256  ;;  %p346_p3 = scmp.lt.s32.totalorder %s213_s8, %s213_s8 }
  0x2a   :  { %264 = vmatprep.subr.bf16.mxu0 %v290_v1  ;;  %v57_v6 = vpack.c.bf16 %v54_v5, %v53_v4  ;;  %v294_v8 = vld [vmem:[#allocation6 + $0x28] sm:$0xff]   ;;  %v296_v10 = vld [vmem:[#allocation6 + $0x38] sm:$0xff]   ;;  %v55_v11 = vld [vmem:[#allocation3 + $0x10] sm:$0xff]  ;;  %p342_p2 = scmp.ne.s32.totalorder %s213_s8, %s341_s9  ;;  %p347_p4 = scmp.lt.s32.totalorder %s341_s9, %s341_s9 }
  0x2b   :  { %v56_v12 = vld [vmem:[#allocation3 + $0x18] sm:$0xff] }
  0x2c   :  { %278 = vmatprep.mubr.bf16.mxu0 %v57_v6  ;;  %v58_v13 = vpack.c.bf16 %v56_v12, %v55_v11  ;;  %p348_p5 = por %p347_p4, %p346_p3 }
  0x2d   :  { %265 = vmatpush3.bf16.msra.mxu0 %v290_v1 }
  0x2e   :  { %266 = vmatprep.subr.bf16.mxu0 %v291_v2  ;;  %p349_p6 = pnand %p348_p5, %p342_p2 }
  0x31   :  { %267 = vmatpush3.bf16.msra.mxu0 %v291_v2 }
  0x32   :  { %268 = vmatprep.subr.bf16.mxu0 %v292_v3 }
  0x35   :  { %269 = vmatpush3.bf16.msra.mxu0 %v292_v3 }
  0x36   :  { %270 = vmatprep.subr.bf16.mxu0 %v293_v7 }
  0x39   :  { %271 = vmatpush3.bf16.msra.mxu0 %v293_v7 }
  0x3a   :  { %272 = vmatprep.subr.bf16.mxu0 %v294_v8 }
  0x3d   :  { %273 = vmatpush3.bf16.msra.mxu0 %v294_v8 }
  0x3e   :  { %274 = vmatprep.subr.bf16.mxu0 %v295_v9 }
  0x41   :  { %275 = vmatpush3.bf16.msra.mxu0 %v295_v9 }
  0x42   :  { %276 = vmatprep.subr.bf16.mxu0 %v296_v10 }
  0x45   :  { %277 = vmatpush3.bf16.msra.mxu0 %v296_v10 }
  0x48   :  { %279 = vmatmul.mubr.bf16.vlgmr.msra.gmra.mrb[0].mxu0 %v58_v13 }
 0x11b   :  { %v280_v14 = vpop.f32.mrb[0].mxu0 }
 0x11c   :  { %v157_v15 = vpop.f32.mrb[1].mxu0 }
 0x11d   :  { %v281_v16 = vpop.f32.mrb[2].mxu0 }
 0x11e   :  { %v249_v17 = vpack.c.bf16 %v281_v16, %v280_v14  ;;  %v160_v18 = vpop.f32.mrb[3].mxu0 }
 0x11f   :  { %v244_v19 = vpack.c.bf16 %v160_v18, %v157_v15 }
 0x120   :  { %251 = vst [vmem:[#allocation8 + $0x8] sm:$0xff] %v249_v17  }
 0x121   :  { %245 = vst [vmem:[#allocation8] sm:$0xff] %v244_v19  }
 0x122   :  { %352 = shalt.err (!%p349_p6)
}
 0x123   :  { %s353_s12 = scalar_lea.hbm %s435_s2, 256 }
 0x124   :  { %p354_p7 = scmp.ne.s32.totalorder %s435_s2, %s353_s12  ;;  %p357_p8 = scmp.lt.u32.totalorder %s353_s12, %s435_s2 }
 0x126   :  { %p359_p9 = pnand %p357_p8, %p354_p7 }
 0x128   :  { %362 = shalt.err (!%p359_p9)
}
 0x129   :  { %218 = dma.vmem_to_hbm [thread:$0]  %s213_s8, 256, %s435_s2, [#allocation5], %s373_s0, %s373_s0, %s374_s5  }
 0x12a   :  { %367 = dma.done.wait [#allocation5], 256  }
 0x12b   :  { %368 = vsyncadd [#allocation5], 4294967040 }
 0x12c   :  { %222 = vsyncpa [#allocation4], 1 }
 0x12d   :  { %223 = vsyncpa [#allocation7], 1 }
 0x12e   :  { %224 = vsyncpa [#allocation5], 1 }

</bundles_post_ra>
